<compile_context>
chip_gen: v5e
topology: v5e:2x2
jax: 0.10.0
libtpu: 0.0.40
codegen_flags: <defaults>
</compile_context>

<pallas_src>
import math

import jax
import jax.numpy as jnp
from jax.experimental import pallas as pl
from jax.experimental.pallas import tpu as pltpu


def _silu(x):
    return x * jax.nn.sigmoid(x)


def _round_up(x, m):
    return ((x + m - 1) // m) * m


def _pad2(x, rows, cols):
    return jnp.pad(x, ((0, rows - x.shape[0]), (0, cols - x.shape[1])))


# ------------------------------ fused kernel --------------------------------

def gcl_fused_kernel(row_ref, st_ref,
                     ew1_ref, eb1_ref, ew2_ref, eb2_ref,
                     h_ref, nw1x_ref, nw1a_ref, nb1_ref, nw2_ref, nb2_ref,
                     mij_ref, hout_ref,
                     agg_ref):
    e = pl.program_id(0)
    n_tiles = pl.num_programs(0)

    @pl.when(e == 0)
    def _init():
        agg_ref[...] = jnp.zeros_like(agg_ref)

    # ---- edge MLP on this tile: single K=2*Fp matmul (src||tgt pre-concat),
    #      bf16 operands, f32 accumulation, bf16 SiLUs. ----
    x = (jnp.dot(st_ref[...], ew1_ref[...], preferred_element_type=jnp.float32)
         + eb1_ref[...])
    x = _silu(x.astype(jnp.bfloat16))                       # (TE, Hp) bf16
    y = (jnp.dot(x, ew2_ref[...], preferred_element_type=jnp.float32)
         + eb2_ref[...])
    m_bf16 = _silu(y.astype(jnp.bfloat16))                  # (TE, Hp) bf16
    mij_ref[...] = m_bf16                                   # lane-dense store

    # ---- streaming unsorted_segment_sum: one-hot(row_tile) @ mij_tile.
    #      Column iota (Np,1) broadcast against rows (1,TE): no (Np,TE) int32
    #      temporary.  Padded edges carry row-id == Np -> all-zero column. ----
    n_nodes = agg_ref.shape[0]
    rows = row_ref[0]                                                # (1, TE)
    node_ids = jax.lax.broadcasted_iota(jnp.int32, (n_nodes, 1), 0)  # (Np, 1)
    onehot = (node_ids == rows).astype(jnp.bfloat16)                 # (Np, TE)
    agg_ref[...] += jnp.dot(onehot, m_bf16,
                            preferred_element_type=jnp.float32)

    # ---- node MLP + residual at the final tile (1/norm pre-folded into
    #      nw1a on the host). ----
    @pl.when(e == n_tiles - 1)
    def _finalize():
        hx = h_ref[...]                                      # (Np, Fp) f32
        t = (jnp.dot(hx.astype(jnp.bfloat16), nw1x_ref[...],
                     preferred_element_type=jnp.float32)
             + jnp.dot(agg_ref[...].astype(jnp.bfloat16), nw1a_ref[...],
                       preferred_element_type=jnp.float32)
             + nb1_ref[...])
        t = _silu(t.astype(jnp.bfloat16))
        o = (jnp.dot(t, nw2_ref[...], preferred_element_type=jnp.float32)
             + nb2_ref[...])
        hout_ref[...] = hx + o                               # residual, f32


# ------------------------------ host wrapper --------------------------------

def gcl_forward(h, row, col, params, normalization_factor, *, edge_tile=None):
    """Pallas implementation of GCL.forward. Returns (h_out f32, mij bf16)."""
    N, F = h.shape
    E = row.shape[0]
    H = params["e_b1"].shape[-1]
    F_out = params["n_b2"].shape[-1]
    assert F_out == F, "residual h + node_mlp(...) requires output_nf == input_nf"

    LANE = 128
    Fp = _round_up(F, LANE)
    Hp = _round_up(H, LANE)
    Kp = _round_up(2 * F, LANE)          # fused src||tgt contraction dim
    Np = _round_up(N, 8)

    # edge tile: multiple of 16 (bf16 sublane packing), multiple of 128 when big.
    if edge_tile is None:
        edge_tile = max(16, min(1024, _round_up(E, 16)))
    else:
        edge_tile = max(16, _round_up(int(edge_tile), 16))
    if edge_tile >= 256:
        edge_tile = _round_up(edge_tile, 128)
    TE = edge_tile
    Ep = _round_up(E, TE)
    n_tiles = Ep // TE

    bf16, f32 = jnp.bfloat16, jnp.float32
    inv_norm = 1.0 / float(normalization_factor)

    # Single concatenated gather (one pass over h instead of two separately
    # padded copies); bf16 halves the gather/HBM bytes.
    h_bf = h.astype(bf16)
    st = _pad2(jnp.concatenate([h_bf[row], h_bf[col]], axis=1), Ep, Kp)
    h_pad = _pad2(h.astype(f32), Np, Fp)                 # f32 for the residual

    # Padded edges get row-id == Np -> never matches a real node in-kernel.
    row_pad = jnp.full((Ep,), Np, jnp.int32).at[:E].set(row.astype(jnp.int32))
    row_t = row_pad.reshape(n_tiles, 1, TE)

    # Parameters: bf16 weights, f32 biases, zero-padded lane-dense.
    ew1 = _pad2(jnp.concatenate([params["e_w1s"], params["e_w1t"]],
                                axis=0).astype(bf16), Kp, Hp)
    eb1 = _pad2(params["e_b1"].astype(f32), 1, Hp)
    ew2 = _pad2(params["e_w2"].astype(bf16), Hp, Hp)
    eb2 = _pad2(params["e_b2"].astype(f32), 1, Hp)
    nw1x = _pad2(params["n_w1x"].astype(bf16), Fp, Hp)
    nw1a = _pad2((params["n_w1a"] * inv_norm).astype(bf16), Hp, Hp)  # fold 1/norm
    nb1 = _pad2(params["n_b1"].astype(f32), 1, Hp)
    nw2 = _pad2(params["n_w2"].astype(bf16), Hp, Fp)
    nb2 = _pad2(params["n_b2"].astype(f32), 1, Fp)

    # VMEM budget estimate (double-buffered specs + scratch + one-hot temps).
    def _b(rows_, cols_, itemsize, bufs):
        return _round_up(rows_, 8) * _round_up(cols_, LANE) * itemsize * bufs
    vmem_est = (
        _b(TE, Kp, 2, 2) + _b(TE, Hp, 2, 2) + _b(1, TE, 4, 2)          # edge tiles
        + _b(Kp, Hp, 2, 2) + _b(Hp, Hp, 2, 2)                          # edge weights
        + _b(Fp, Hp, 2, 2) + _b(Hp, Hp, 2, 2) + _b(Hp, Fp, 2, 2)       # node weights
        + 3 * _b(1, Hp, 4, 2) + 2 * _b(1, Fp, 4, 2)                    # biases
        + 2 * _b(Np, Fp, 4, 2)                                         # h + hout
        + _b(Np, Hp, 4, 1)                                             # agg scratch
        + 2 * _b(Np, TE, 2, 1)                                         # one-hot temps
    )
    vmem_limit = int(min(max(2 * vmem_est, 32 * 2**20), 64 * 2**20))

    in_specs = [
        pl.BlockSpec((1, 1, TE), lambda e: (e, 0, 0)),   # row ids (pipelined)
        pl.BlockSpec((TE, Kp), lambda e: (e, 0)),        # src||tgt tile (pipelined)
        pl.BlockSpec((Kp, Hp), lambda e: (0, 0)),        # e_w1 fused (resident)
        pl.BlockSpec((1, Hp), lambda e: (0, 0)),         # e_b1
        pl.BlockSpec((Hp, Hp), lambda e: (0, 0)),        # e_w2
        pl.BlockSpec((1, Hp), lambda e: (0, 0)),         # e_b2
        pl.BlockSpec((Np, Fp), lambda e: (0, 0)),        # h (resident)
        pl.BlockSpec((Fp, Hp), lambda e: (0, 0)),        # n_w1 (x half)
        pl.BlockSpec((Hp, Hp), lambda e: (0, 0)),        # n_w1 (agg half, pre-scaled)
        pl.BlockSpec((1, Hp), lambda e: (0, 0)),         # n_b1
        pl.BlockSpec((Hp, Fp), lambda e: (0, 0)),        # n_w2
        pl.BlockSpec((1, Fp), lambda e: (0, 0)),         # n_b2
    ]
    out_specs = (
        pl.BlockSpec((TE, Hp), lambda e: (e, 0)),        # mij tile
        pl.BlockSpec((Np, Fp), lambda e: (0, 0)),        # h_out (resident)
    )
    out_shape = (
        jax.ShapeDtypeStruct((Ep, Hp), bf16),
        jax.ShapeDtypeStruct((Np, Fp), f32),
    )

    mij_pad, hout_pad = pl.pallas_call(
        gcl_fused_kernel,
        out_shape=out_shape,
        grid=(n_tiles,),
        in_specs=in_specs,
        out_specs=out_specs,
        scratch_shapes=[pltpu.VMEM((Np, Hp), jnp.float32)],   # agg accumulator
        compiler_params=pltpu.CompilerParams(
            dimension_semantics=("arbitrary",),               # reduction axis
            vmem_limit_bytes=vmem_limit),
    )(row_t, st, ew1, eb1, ew2, eb2, h_pad, nw1x, nw1a, nb1, nw2, nb2)

    mij = mij_pad[:E, :H]                 # bf16 (kernel-native precision)
    h_out = hout_pad[:N, :F]              # f32
    return h_out, mij


# ----------------------- deterministic parameter init -----------------------

def init_params(key, input_nf, output_nf, hidden_nf):
    def linear(key, fan_in, fan_out):
        kw, kb = jax.random.split(key)
        bound = 1.0 / math.sqrt(fan_in)
        w = jax.random.uniform(kw, (fan_in, fan_out), jnp.float32, -bound, bound)
        b = jax.random.uniform(kb, (1, fan_out), jnp.float32, -bound, bound)
        return w, b

    k = jax.random.split(key, 4)
    input_edge = 2 * input_nf
    e_w1, e_b1 = linear(k[0], input_edge, hidden_nf)
    e_w2, e_b2 = linear(k[1], hidden_nf, hidden_nf)
    n_w1, n_b1 = linear(k[2], hidden_nf + input_nf, hidden_nf)
    n_w2, n_b2 = linear(k[3], hidden_nf, output_nf)
    return {
        "e_w1s": e_w1[:input_nf], "e_w1t": e_w1[input_nf:], "e_b1": e_b1,
        "e_w2": e_w2, "e_b2": e_b2,
        "n_w1x": n_w1[:input_nf], "n_w1a": n_w1[input_nf:], "n_b1": n_b1,
        "n_w2": n_w2, "n_b2": n_b2,
    }


# ------------------ pure-JAX reference (mirrors bf16 casts) ------------------

def gcl_reference(h, row, col, params, normalization_factor):
    bf = lambda a: a.astype(jnp.bfloat16)
    f32 = jnp.float32
    inv = 1.0 / float(normalization_factor)

    st = jnp.concatenate([h[row], h[col]], axis=1)
    w1 = jnp.concatenate([params["e_w1s"], params["e_w1t"]], axis=0)
    x = jnp.dot(bf(st), bf(w1), preferred_element_type=f32) + params["e_b1"]
    x = _silu(bf(x))
    y = jnp.dot(x, bf(params["e_w2"]), preferred_element_type=f32) + params["e_b2"]
    mij = _silu(bf(y))                                       # bf16, like kernel

    N = h.shape[0]
    agg = jnp.zeros((N, mij.shape[1]), f32).at[row].add(mij.astype(f32))
    t = _silu(bf(jnp.dot(bf(h), bf(params["n_w1x"]), preferred_element_type=f32)
                 + jnp.dot(bf(agg), bf(params["n_w1a"] * inv),
                           preferred_element_type=f32)
                 + params["n_b1"]))
    h_out = h + (jnp.dot(t, bf(params["n_w2"]), preferred_element_type=f32)
                 + params["n_b2"])
    return h_out, mij


# ----------------------------------- main ------------------------------------

if __name__ == "__main__":
    N = 8              # nodes
    F = 32             # input_nf == output_nf (needed for residual)
    H = 32             # hidden_nf
    NORM = 4.0         # normalization_factor, aggregation_method='sum'

    key = jax.random.PRNGKey(0)
    kh, kp = jax.random.split(key)
    h = jax.random.normal(kh, (N, F), jnp.float32)

    # all ordered pairs i != j (typical EGNN edge list); E = 56 is NOT a
    # multiple of the edge tile, so the tail-padding / row-mask path runs.
    rows, cols = [], []
    for i in range(N):
        for j in range(N):
            if i != j:
                rows.append(i)
                cols.append(j)
    row = jnp.array(rows, dtype=jnp.int32)
    col = jnp.array(cols, dtype=jnp.int32)

    params = init_params(kp, F, F, H)

    # edge_tile=32 -> grid of 2 tiles: exercises the accumulator across steps
    # and the padded-tail masking.  For real graphs use 512-2048.
    h_out, mij = gcl_forward(h, row, col, params, NORM, edge_tile=32)
    jax.block_until_ready((h_out, mij))

    h_ref, mij_ref = gcl_reference(h, row, col, params, NORM)
    mij_f, mij_ref_f = mij.astype(jnp.float32), mij_ref.astype(jnp.float32)
    assert jnp.allclose(mij_f, mij_ref_f, rtol=1e-2, atol=1e-2), (
        "mij mismatch, max err %e" % jnp.max(jnp.abs(mij_f - mij_ref_f)))
    assert jnp.allclose(h_out, h_ref, rtol=1e-2, atol=1e-2), (
        "h_out mismatch, max err %e" % jnp.max(jnp.abs(h_out - h_ref)))

    print("KERNEL_OK")
</pallas_src>

<mosaic_0001>
module attributes {stable_mosaic.version = 11 : i64} {
  func.func @gcl_fused_kernel(%arg0: i32, %arg1: memref<1x1x32xi32, #tpu.memory_space<vmem>>, %arg2: memref<32x128xbf16, #tpu.memory_space<vmem>>, %arg3: memref<128x128xbf16, #tpu.memory_space<vmem>>, %arg4: memref<1x128xf32, #tpu.memory_space<vmem>>, %arg5: memref<128x128xbf16, #tpu.memory_space<vmem>>, %arg6: memref<1x128xf32, #tpu.memory_space<vmem>>, %arg7: memref<8x128xf32, #tpu.memory_space<vmem>>, %arg8: memref<128x128xbf16, #tpu.memory_space<vmem>>, %arg9: memref<128x128xbf16, #tpu.memory_space<vmem>>, %arg10: memref<1x128xf32, #tpu.memory_space<vmem>>, %arg11: memref<128x128xbf16, #tpu.memory_space<vmem>>, %arg12: memref<1x128xf32, #tpu.memory_space<vmem>>, %arg13: memref<32x128xbf16, #tpu.memory_space<vmem>>, %arg14: memref<8x128xf32, #tpu.memory_space<vmem>>, %arg15: memref<8x128xf32, #tpu.memory_space<vmem>>) attributes {dimension_semantics = [#tpu.dimension_semantics<arbitrary>], iteration_bounds = array<i64: 2>, scalar_prefetch = 0 : i64, scratch_operands = 1 : i64, tpu.core_type = #tpu.core_type<tc>, window_params = [{transform_indices = @transform_0, window_bounds = array<i64: 1, 1, 32>}, {transform_indices = @transform_1, window_bounds = array<i64: 32, 128>}, {pipeline_mode = #tpu.pipeline_mode<synchronous>, transform_indices = @transform_2, window_bounds = array<i64: 128, 128>}, {pipeline_mode = #tpu.pipeline_mode<synchronous>, transform_indices = @transform_3, window_bounds = array<i64: 1, 128>}, {pipeline_mode = #tpu.pipeline_mode<synchronous>, transform_indices = @transform_4, window_bounds = array<i64: 128, 128>}, {pipeline_mode = #tpu.pipeline_mode<synchronous>, transform_indices = @transform_5, window_bounds = array<i64: 1, 128>}, {pipeline_mode = #tpu.pipeline_mode<synchronous>, transform_indices = @transform_6, window_bounds = array<i64: 8, 128>}, {pipeline_mode = #tpu.pipeline_mode<synchronous>, transform_indices = @transform_7, window_bounds = array<i64: 128, 128>}, {pipeline_mode = #tpu.pipeline_mode<synchronous>, transform_indices = @transform_8, window_bounds = array<i64: 128, 128>}, {pipeline_mode = #tpu.pipeline_mode<synchronous>, transform_indices = @transform_9, window_bounds = array<i64: 1, 128>}, {pipeline_mode = #tpu.pipeline_mode<synchronous>, transform_indices = @transform_10, window_bounds = array<i64: 128, 128>}, {pipeline_mode = #tpu.pipeline_mode<synchronous>, transform_indices = @transform_11, window_bounds = array<i64: 1, 128>}, {transform_indices = @transform_12, window_bounds = array<i64: 32, 128>}, {pipeline_mode = #tpu.pipeline_mode<synchronous>, transform_indices = @transform_13, window_bounds = array<i64: 8, 128>}]} {
    %c0_i32 = arith.constant 0 : i32
    %0 = arith.cmpi eq, %arg0, %c0_i32 : i32
    %1 = arith.extui %0 : i1 to i32
    %c0_i32_0 = arith.constant 0 : i32
    %2 = arith.cmpi ne, %1, %c0_i32_0 : i32
    scf.if %2 {
      %cst_24 = arith.constant 0.000000e+00 : f32
      %45 = vector.broadcast %cst_24 : f32 to vector<8x128xf32>
      %c0_25 = arith.constant 0 : index
      %c0_26 = arith.constant 0 : index
      %46 = vector.load %arg15[%c0_25, %c0_26] : memref<8x128xf32, #tpu.memory_space<vmem>>, vector<8x128xf32>
      tpu.vector_store %arg15[%c0_25, %c0_26], %45 {strides = array<i32>} : memref<8x128xf32, #tpu.memory_space<vmem>>, vector<8x128xf32>,
    } else {
    }
    %c0 = arith.constant 0 : index
    %c0_1 = arith.constant 0 : index
    %3 = vector.load %arg2[%c0, %c0_1] : memref<32x128xbf16, #tpu.memory_space<vmem>>, vector<32x128xbf16>
    %c0_2 = arith.constant 0 : index
    %c0_3 = arith.constant 0 : index
    %4 = vector.load %arg3[%c0_2, %c0_3] : memref<128x128xbf16, #tpu.memory_space<vmem>>, vector<128x128xbf16>
    %cst = arith.constant dense<0.000000e+00> : vector<32x128xf32>
    %5 = tpu.matmul %3, %4, %cst {dimension_numbers = #tpu.dot_dimension_numbers<[1], [0], [0], [1], [0, 0, 1, 1], [], []>} : vector<32x128xbf16>, vector<128x128xbf16>, vector<32x128xf32> -> vector<32x128xf32>
    %c0_4 = arith.constant 0 : index
    %c0_5 = arith.constant 0 : index
    %6 = vector.load %arg4[%c0_4, %c0_5] : memref<1x128xf32, #tpu.memory_space<vmem>>, vector<1x128xf32>
    %7 = vector.broadcast %6 : vector<1x128xf32> to vector<32x128xf32>
    %8 = arith.addf %5, %7 : vector<32x128xf32>
    %9 = arith.truncf %8 : vector<32x128xf32> to vector<32x128xbf16>
    %10 = arith.negf %9 : vector<32x128xbf16>
    %11 = math.exp %10 : vector<32x128xbf16>
    %cst_6 = arith.constant 1.000000e+00 : bf16
    %12 = vector.broadcast %cst_6 : bf16 to vector<32x128xbf16>
    %13 = arith.addf %12, %11 : vector<32x128xbf16>
    %14 = arith.divf %12, %13 : vector<32x128xbf16>
    %15 = arith.mulf %9, %14 : vector<32x128xbf16>
    %c0_7 = arith.constant 0 : index
    %c0_8 = arith.constant 0 : index
    %16 = vector.load %arg5[%c0_7, %c0_8] : memref<128x128xbf16, #tpu.memory_space<vmem>>, vector<128x128xbf16>
    %cst_9 = arith.constant dense<0.000000e+00> : vector<32x128xf32>
    %17 = tpu.matmul %15, %16, %cst_9 {dimension_numbers = #tpu.dot_dimension_numbers<[1], [0], [0], [1], [0, 0, 1, 1], [], []>} : vector<32x128xbf16>, vector<128x128xbf16>, vector<32x128xf32> -> vector<32x128xf32>
    %c0_10 = arith.constant 0 : index
    %c0_11 = arith.constant 0 : index
    %18 = vector.load %arg6[%c0_10, %c0_11] : memref<1x128xf32, #tpu.memory_space<vmem>>, vector<1x128xf32>
    %19 = vector.broadcast %18 : vector<1x128xf32> to vector<32x128xf32>
    %20 = arith.addf %17, %19 : vector<32x128xf32>
    %21 = arith.truncf %20 : vector<32x128xf32> to vector<32x128xbf16>
    %22 = arith.negf %21 : vector<32x128xbf16>
    %23 = math.exp %22 : vector<32x128xbf16>
    %cst_12 = arith.constant 1.000000e+00 : bf16
    %24 = vector.broadcast %cst_12 : bf16 to vector<32x128xbf16>
    %25 = arith.addf %24, %23 : vector<32x128xbf16>
    %26 = arith.divf %24, %25 : vector<32x128xbf16>
    %27 = arith.mulf %21, %26 : vector<32x128xbf16>
    %c0_13 = arith.constant 0 : index
    %c0_14 = arith.constant 0 : index
    %28 = vector.load %arg13[%c0_13, %c0_14] : memref<32x128xbf16, #tpu.memory_space<vmem>>, vector<32x128xbf16>
    tpu.vector_store %arg13[%c0_13, %c0_14], %27 {strides = array<i32>} : memref<32x128xbf16, #tpu.memory_space<vmem>>, vector<32x128xbf16>,
    %c0_15 = arith.constant 0 : index
    %c0_16 = arith.constant 0 : index
    %c0_17 = arith.constant 0 : index
    %29 = vector.load %arg1[%c0_15, %c0_16, %c0_17] : memref<1x1x32xi32, #tpu.memory_space<vmem>>, vector<1x1x32xi32>
    %30 = vector.shape_cast %29 : vector<1x1x32xi32> to vector<1x32xi32>
    %31 = tpu.iota {dimensions = array<i32: 0>} : vector<8x1xi32>
    %32 = vector.broadcast %31 : vector<8x1xi32> to vector<8x32xi32>
    %33 = vector.broadcast %30 : vector<1x32xi32> to vector<8x32xi32>
    %34 = arith.cmpi eq, %32, %33 : vector<8x32xi32>
    %35 = arith.extui %34 : vector<8x32xi1> to vector<8x32xi32>
    %36 = arith.sitofp %35 : vector<8x32xi32> to vector<8x32xf32>
    %37 = arith.truncf %36 : vector<8x32xf32> to vector<8x32xbf16>
    %c0_18 = arith.constant 0 : index
    %c0_19 = arith.constant 0 : index
    %38 = vector.load %arg15[%c0_18, %c0_19] : memref<8x128xf32, #tpu.memory_space<vmem>>, vector<8x128xf32>
    %cst_20 = arith.constant dense<0.000000e+00> : vector<8x128xf32>
    %39 = tpu.matmul %37, %27, %cst_20 {dimension_numbers = #tpu.dot_dimension_numbers<[1], [0], [0], [1], [0, 0, 1, 1], [], []>} : vector<8x32xbf16>, vector<32x128xbf16>, vector<8x128xf32> -> vector<8x128xf32>
    %40 = arith.addf %38, %39 : vector<8x128xf32>
    %c0_21 = arith.constant 0 : index
    %c0_22 = arith.constant 0 : index
    %41 = vector.load %arg15[%c0_21, %c0_22] : memref<8x128xf32, #tpu.memory_space<vmem>>, vector<8x128xf32>
    tpu.vector_store %arg15[%c0_21, %c0_22], %40 {strides = array<i32>} : memref<8x128xf32, #tpu.memory_space<vmem>>, vector<8x128xf32>,
    %c1_i32 = arith.constant 1 : i32
    %42 = arith.cmpi eq, %arg0, %c1_i32 : i32
    %43 = arith.extui %42 : i1 to i32
    %c0_i32_23 = arith.constant 0 : i32
    %44 = arith.cmpi ne, %43, %c0_i32_23 : i32
    scf.if %44 {
      %c0_24 = arith.constant 0 : index
      %c0_25 = arith.constant 0 : index
      %45 = vector.load %arg7[%c0_24, %c0_25] : memref<8x128xf32, #tpu.memory_space<vmem>>, vector<8x128xf32>
      %46 = arith.truncf %45 : vector<8x128xf32> to vector<8x128xbf16>
      %c0_26 = arith.constant 0 : index
      %c0_27 = arith.constant 0 : index
      %47 = vector.load %arg8[%c0_26, %c0_27] : memref<128x128xbf16, #tpu.memory_space<vmem>>, vector<128x128xbf16>
      %cst_28 = arith.constant dense<0.000000e+00> : vector<8x128xf32>
      %48 = tpu.matmul %46, %47, %cst_28 {dimension_numbers = #tpu.dot_dimension_numbers<[1], [0], [0], [1], [0, 0, 1, 1], [], []>} : vector<8x128xbf16>, vector<128x128xbf16>, vector<8x128xf32> -> vector<8x128xf32>
      %c0_29 = arith.constant 0 : index
      %c0_30 = arith.constant 0 : index
      %49 = vector.load %arg15[%c0_29, %c0_30] : memref<8x128xf32, #tpu.memory_space<vmem>>, vector<8x128xf32>
      %50 = arith.truncf %49 : vector<8x128xf32> to vector<8x128xbf16>
      %c0_31 = arith.constant 0 : index
      %c0_32 = arith.constant 0 : index
      %51 = vector.load %arg9[%c0_31, %c0_32] : memref<128x128xbf16, #tpu.memory_space<vmem>>, vector<128x128xbf16>
      %cst_33 = arith.constant dense<0.000000e+00> : vector<8x128xf32>
      %52 = tpu.matmul %50, %51, %cst_33 {dimension_numbers = #tpu.dot_dimension_numbers<[1], [0], [0], [1], [0, 0, 1, 1], [], []>} : vector<8x128xbf16>, vector<128x128xbf16>, vector<8x128xf32> -> vector<8x128xf32>
      %53 = arith.addf %48, %52 : vector<8x128xf32>
      %c0_34 = arith.constant 0 : index
      %c0_35 = arith.constant 0 : index
      %54 = vector.load %arg10[%c0_34, %c0_35] : memref<1x128xf32, #tpu.memory_space<vmem>>, vector<1x128xf32>
      %55 = vector.broadcast %54 : vector<1x128xf32> to vector<8x128xf32>
      %56 = arith.addf %53, %55 : vector<8x128xf32>
      %57 = arith.truncf %56 : vector<8x128xf32> to vector<8x128xbf16>
      %58 = arith.negf %57 : vector<8x128xbf16>
      %59 = math.exp %58 : vector<8x128xbf16>
      %cst_36 = arith.constant 1.000000e+00 : bf16
      %60 = vector.broadcast %cst_36 : bf16 to vector<8x128xbf16>
      %61 = arith.addf %60, %59 : vector<8x128xbf16>
      %62 = arith.divf %60, %61 : vector<8x128xbf16>
      %63 = arith.mulf %57, %62 : vector<8x128xbf16>
      %c0_37 = arith.constant 0 : index
      %c0_38 = arith.constant 0 : index
      %64 = vector.load %arg11[%c0_37, %c0_38] : memref<128x128xbf16, #tpu.memory_space<vmem>>, vector<128x128xbf16>
      %cst_39 = arith.constant dense<0.000000e+00> : vector<8x128xf32>
      %65 = tpu.matmul %63, %64, %cst_39 {dimension_numbers = #tpu.dot_dimension_numbers<[1], [0], [0], [1], [0, 0, 1, 1], [], []>} : vector<8x128xbf16>, vector<128x128xbf16>, vector<8x128xf32> -> vector<8x128xf32>
      %c0_40 = arith.constant 0 : index
      %c0_41 = arith.constant 0 : index
      %66 = vector.load %arg12[%c0_40, %c0_41] : memref<1x128xf32, #tpu.memory_space<vmem>>, vector<1x128xf32>
      %67 = vector.broadcast %66 : vector<1x128xf32> to vector<8x128xf32>
      %68 = arith.addf %65, %67 : vector<8x128xf32>
      %69 = arith.addf %45, %68 : vector<8x128xf32>
      %c0_42 = arith.constant 0 : index
      %c0_43 = arith.constant 0 : index
      %70 = vector.load %arg14[%c0_42, %c0_43] : memref<8x128xf32, #tpu.memory_space<vmem>>, vector<8x128xf32>
      tpu.vector_store %arg14[%c0_42, %c0_43], %69 {strides = array<i32>} : memref<8x128xf32, #tpu.memory_space<vmem>>, vector<8x128xf32>,
    } else {
    }
    return
  }
  func.func @transform_0(%arg0: i32) -> (i32, i32, i32) {
    %c0_i32 = arith.constant 0 : i32
    %c0_i32_0 = arith.constant 0 : i32
    %c0_i32_1 = arith.constant 0 : i32
    return %arg0, %c0_i32, %c0_i32_0 : i32, i32, i32
  }
  func.func @transform_1(%arg0: i32) -> (i32, i32) {
    %c0_i32 = arith.constant 0 : i32
    %c0_i32_0 = arith.constant 0 : i32
    return %arg0, %c0_i32 : i32, i32
  }
  func.func @transform_2(%arg0: i32) -> (i32, i32) {
    %c0_i32 = arith.constant 0 : i32
    %c0_i32_0 = arith.constant 0 : i32
    %c0_i32_1 = arith.constant 0 : i32
    return %c0_i32, %c0_i32_0 : i32, i32
  }
  func.func @transform_3(%arg0: i32) -> (i32, i32) {
    %c0_i32 = arith.constant 0 : i32
    %c0_i32_0 = arith.constant 0 : i32
    %c0_i32_1 = arith.constant 0 : i32
    return %c0_i32, %c0_i32_0 : i32, i32
  }
  func.func @transform_4(%arg0: i32) -> (i32, i32) {
    %c0_i32 = arith.constant 0 : i32
    %c0_i32_0 = arith.constant 0 : i32
    %c0_i32_1 = arith.constant 0 : i32
    return %c0_i32, %c0_i32_0 : i32, i32
  }
  func.func @transform_5(%arg0: i32) -> (i32, i32) {
    %c0_i32 = arith.constant 0 : i32
    %c0_i32_0 = arith.constant 0 : i32
    %c0_i32_1 = arith.constant 0 : i32
    return %c0_i32, %c0_i32_0 : i32, i32
  }
  func.func @transform_6(%arg0: i32) -> (i32, i32) {
    %c0_i32 = arith.constant 0 : i32
    %c0_i32_0 = arith.constant 0 : i32
    %c0_i32_1 = arith.constant 0 : i32
    return %c0_i32, %c0_i32_0 : i32, i32
  }
  func.func @transform_7(%arg0: i32) -> (i32, i32) {
    %c0_i32 = arith.constant 0 : i32
    %c0_i32_0 = arith.constant 0 : i32
    %c0_i32_1 = arith.constant 0 : i32
    return %c0_i32, %c0_i32_0 : i32, i32
  }
  func.func @transform_8(%arg0: i32) -> (i32, i32) {
    %c0_i32 = arith.constant 0 : i32
    %c0_i32_0 = arith.constant 0 : i32
    %c0_i32_1 = arith.constant 0 : i32
    return %c0_i32, %c0_i32_0 : i32, i32
  }
  func.func @transform_9(%arg0: i32) -> (i32, i32) {
    %c0_i32 = arith.constant 0 : i32
    %c0_i32_0 = arith.constant 0 : i32
    %c0_i32_1 = arith.constant 0 : i32
    return %c0_i32, %c0_i32_0 : i32, i32
  }
  func.func @transform_10(%arg0: i32) -> (i32, i32) {
    %c0_i32 = arith.constant 0 : i32
    %c0_i32_0 = arith.constant 0 : i32
    %c0_i32_1 = arith.constant 0 : i32
    return %c0_i32, %c0_i32_0 : i32, i32
  }
  func.func @transform_11(%arg0: i32) -> (i32, i32) {
    %c0_i32 = arith.constant 0 : i32
    %c0_i32_0 = arith.constant 0 : i32
    %c0_i32_1 = arith.constant 0 : i32
    return %c0_i32, %c0_i32_0 : i32, i32
  }
  func.func @transform_12(%arg0: i32) -> (i32, i32) {
    %c0_i32 = arith.constant 0 : i32
    %c0_i32_0 = arith.constant 0 : i32
    return %arg0, %c0_i32 : i32, i32
  }
  func.func @transform_13(%arg0: i32) -> (i32, i32) {
    %c0_i32 = arith.constant 0 : i32
    %c0_i32_0 = arith.constant 0 : i32
    %c0_i32_1 = arith.constant 0 : i32
    return %c0_i32, %c0_i32_0 : i32, i32
  }
}

</mosaic_0001>

<bundles_post_ra>
// kernel: tpu_custom_call.1
= control target key start
LH: loop header
LB: loop body
LE: loop exit
PB: predicated region body
PF: predicated region fallthrough
CT: control target
= control target key end

     0   :  { %s2666_s0 = inlined_call_operand.hbm [shape: s32[2,1,32], index: 0, kind: input, shape index: {}]   ;;  %s2667_s1 = inlined_call_operand.hbm [shape: bf16[64,128], index: 1, kind: input, shape index: {}]   ;;  %s2668_s2 = inlined_call_operand.hbm [shape: bf16[128,128], index: 2, kind: input, shape index: {}]   ;;  %s2669_s3 = inlined_call_operand.vmem [shape: f32[1,128], index: 3, kind: input, shape index: {}]   ;;  %s2670_s4 = inlined_call_operand.hbm [shape: bf16[128,128], index: 4, kind: input, shape index: {}]   ;;  %s2671_s5 = inlined_call_operand.vmem [shape: f32[1,128], index: 5, kind: input, shape index: {}]   ;;  %s2672_s6 = inlined_call_operand.hbm [shape: f32[8,128], index: 6, kind: input, shape index: {}]   ;;  %s2673_s7 = inlined_call_operand.hbm [shape: bf16[128,128], index: 7, kind: input, shape index: {}]   ;;  %s2674_s8 = inlined_call_operand.hbm [shape: bf16[128,128], index: 8, kind: input, shape index: {}]   ;;  %s2675_s9 = inlined_call_operand.vmem [shape: f32[1,128], index: 9, kind: input, shape index: {}]   ;;  %s2676_s10 = inlined_call_operand.hbm [shape: bf16[128,128], index: 10, kind: input, shape index: {}]   ;;  %s2677_s11 = inlined_call_operand.vmem [shape: f32[1,128], index: 11, kind: input, shape index: {}]   ;;  %s2678_s12 = inlined_call_operand.hbm [shape: bf16[64,128], index: 12, kind: output, shape index: {0}]   ;;  %s2679_s13 = inlined_call_operand.hbm [shape: f32[8,128], index: 13, kind: output, shape index: {1}]  }
   0x1   :  { %2688 = sst [smem:[#allocation33_spill]] %s2668_s2 }
   0x2   :  { %2689 = sst [smem:[#allocation34_spill]] %s2670_s4 }
   0x3   :  { %2690 = sst [smem:[#allocation35_spill]] %s2672_s6 }
   0x4   :  { %2691 = sst [smem:[#allocation36_spill]] %s2673_s7 }
   0x5   :  { %2692 = sst [smem:[#allocation37_spill]] %s2674_s8 }
   0x6   :  { %2693 = sst [smem:[#allocation38_spill]] %s2676_s10 }
   0x7   :  { %2694 = sst [smem:[#allocation39_spill]] %s2679_s13 }
   0x8   :  { %19 = vsyncpa [#allocation4], 0 }
   0x9   :  { %21 = vsyncpa [#allocation4 + $0x1], 0 }
   0xa   :  { %22 = vsyncpa [#allocation7], 0 }
   0xb   :  { %24 = vsyncpa [#allocation7 + $0x1], 0 }
   0xc   :  { %25 = vsyncpa [#allocation10], 0 }
   0xd   :  { %26 = vsyncpa [#allocation13], 0 }
   0xe   :  { %27 = vsyncpa [#allocation16], 0 }
   0xf   :  { %28 = vsyncpa [#allocation5], 0 }
  0x10   :  { %30 = vsyncpa [#allocation5 + $0x1], 0 }
  0x11   :  { %31 = vsyncpa [#allocation19], 0  ;;  %s2346_s25 = smov 0   ;;  %s2348_s26 = smov 0  }
  0x12   :  { %s2350_s27 = smov 0   ;;  %s2352_s28 = smov 0  }
  0x13 LB: > { %2695 = sst [smem:[#allocation28_spill]] %s2248_s25  ;;  %s2370_s15 = sadd.s32 4294967295, %s2260_s28   ;;  %s2260_s28 = sphi %s2352_s28, %s2723_s28   ;;  %s2256_s27 = sphi %s2350_s27, %s2725_s27   ;;  %s2252_s26 = sphi %s2348_s26, %s2727_s26   ;;  %s2248_s25 = sphi %s2346_s25, %s2726_s25  }
  0x14   : > { %2696 = sst [smem:[#allocation29_spill]] %s2256_s27  ;;  %p1455_p0 = scmp.ge.s32.totalorder %s2260_s28, 1 }
  0x15   : > { %s2697_s2 = sld [smem:[#allocation33_spill]]  ;;  %p58_p1 = scmp.eq.s32.totalorder %s2370_s15, 0 }
  0x16   : > { %p351_p2 = scmp.lt.s32.totalorder %s2260_s28, 3  ;;  %s2262_s17 = smov [#allocation8]  }
  0x17   : > { %s364_s18 = sshll.u32 %s2262_s17, 4  ;;  %s2699_s4 = sld [smem:[#allocation34_spill]]  ;;  %s365_s18 = int_to_ptr.vmem [resolvable:$true] %s364_s18 }
  0x18   : > { %p2376_p4 = pnand %p1455_p0, %p351_p2  ;;  %s2701_s7 = sld [smem:[#allocation36_spill]] }
  0x19   : > { %s2263_s30 = smov [#allocation9]   ;;  %s2681_s13 = smov 4  }
  0x1a   : > { %p1751_p5 = pneg %p2376_p4  ;;  %s381_s17 = sshll.u32 %s2263_s30, 4  ;;  %s382_s17 = int_to_ptr.vmem [resolvable:$true] %s381_s17 }
  0x1b   : > { %s362_s14 = sshll.u32 %s2697_s2, 4  ;;  %s2680_s2 = smov 64   ;;  %s363_s14 = int_to_ptr.hbm [resolvable:$true] %s362_s14 }
  0x1c   : > { %p2388_p7 = pnand %p1751_p5, %p58_p1  ;;  %s2702_s6 = sld [smem:[#allocation35_spill]] }
  0x1d   : > { %s379_s21 = sshll.u32 %s2699_s4, 4  ;;  %s2266_s24 = smov [#allocation12]   ;;  %s380_s21 = int_to_ptr.hbm [resolvable:$true] %s379_s21 }
  0x1e   : > { %s408_s29 = sshll.u32 %s2701_s7, 4  ;;  %s410_s30 = sshll.u32 %s2266_s24, 4  ;;  %s409_s29 = int_to_ptr.hbm [resolvable:$true] %s408_s29  ;;  %s411_s30 = int_to_ptr.vmem [resolvable:$true] %s410_s30 }
  0x1f   : > { %1754 = dma.hbm_to_vmem [thread:$0]  (!%p2388_p7), %s363_s14, 1024, %s365_s18, [#allocation7], %s2680_s2, %s2680_s2, %s2681_s13  }
  0x20   : > { %1757 = dma.hbm_to_vmem [thread:$0]  (!%p2388_p7), %s380_s21, 1024, %s382_s17, [#allocation10], %s2680_s2, %s2680_s2, %s2681_s13  }
  0x21   : > { %1763 = dma.hbm_to_vmem [thread:$0]  (!%p2388_p7), %s409_s29, 1024, %s411_s30, [#allocation13], %s2680_s2, %s2680_s2, %s2681_s13  }
  0x22   : > { %s397_s23 = sshll.u32 %s2702_s6, 4  ;;  %s2267_s14 = smov [#allocation11]   ;;  %s398_s23 = int_to_ptr.hbm [resolvable:$true] %s397_s23 }
  0x23   : > { %s399_s18 = sshll.u32 %s2267_s14, 4  ;;  %s2703_s8 = sld [smem:[#allocation37_spill]]  ;;  %s400_s18 = int_to_ptr.vmem [resolvable:$true] %s399_s18 }
  0x24   : > { %1760 = dma.hbm_to_vmem [thread:$0]  (!%p2388_p7), %s398_s23, 128, %s400_s18, [#allocation10]  }
  0x25   : > { %s2704_s10 = sld [smem:[#allocation38_spill]]  ;;  %s2268_s24 = smov [#allocation14]  }
  0x26   : > { %s424_s30 = sshll.u32 %s2268_s24, 4  ;;  %s2269_s4 = smov [#allocation15]   ;;  %s425_s30 = int_to_ptr.vmem [resolvable:$true] %s424_s30 }
  0x27   : > { %s441_s23 = sshll.u32 %s2269_s4, 4  ;;  %s1454_s14 = sadd.s32 4294967294, %s2260_s28   ;;  %s442_s23 = int_to_ptr.vmem [resolvable:$true] %s441_s23 }
  0x28   : > { %s2433_s18 = sadd.s32 1, %s2260_s28   ;;  %s44_s19 = sadd.s32 1, %s2256_s27 }
  0x29   : > { %s422_s17 = sshll.u32 %s2703_s8, 4  ;;  %2705 = sst [smem:[#allocation30_spill]] %s2433_s18  ;;  %s423_s17 = int_to_ptr.hbm [resolvable:$true] %s422_s17 }
  0x2a   : > { %1766 = dma.hbm_to_vmem [thread:$0]  (!%p2388_p7), %s423_s17, 1024, %s425_s30, [#allocation13], %s2680_s2, %s2680_s2, %s2681_s13  }
  0x2b   : > { %s439_s29 = sshll.u32 %s2704_s10, 4  ;;  %s41_s21 = ssub.s32 %s2260_s28, %s2433_s18  ;;  %s440_s29 = int_to_ptr.hbm [resolvable:$true] %s439_s29 }
  0x2c   : > { %1769 = dma.hbm_to_vmem [thread:$0]  (!%p2388_p7), %s440_s29, 1024, %s442_s23, [#allocation16], %s2680_s2, %s2680_s2, %s2681_s13  }
  0x2d   : > { %p42_p8 = scmp.eq.s32.totalorder %s41_s21, 0  ;;  %p51_p9 = scmp.ne.s32.totalorder %s2256_s27, %s2252_s26 }
  0x2e   : > { %p52_p10 = scmp.eq.s32.totalorder %s2260_s28, 0  ;;  %p57_p11 = scmp.ne.s32.totalorder %s2252_s26, %s2248_s25 }
  0x2f   : > { %s2444_s17 = scalar_select %p42_p8, %s2256_s27, %s44_s19  }
  0x30   : > { %p2446_p12 = por %p52_p10, %p51_p9  ;;  %p2452_p13 = por %p58_p1, %p57_p11 }
  0x31   : > { %2706 = sst [smem:[#allocation31_spill]] %s2444_s17  ;;  %p2682_p0 = scmp.eq.s32.totalorder %s2370_s15, 1 }
  0x32   : > { %p323_p2 = scmp.eq.s32.totalorder %s1454_s14, 1  ;;  %p1787_p5 = scmp.lt.s32.totalorder %s2260_s28, 2 }
  0x33   : > { %s458_s29 = sand.u32 1, %s2256_s27   ;;  %p2461_p7 = por %p2682_p0, %p51_p9 }
  0x34   : > { %p2465_p8 = por %p323_p2, %p57_p11  ;;  %s464_s21 = scalar_lea.hbm %s2666_s0, %s2260_s28 }
  0x35   : > { %s461_s19 = scalar_lea.vmem [#allocation3], %s458_s29  ;;  %s466_s13 = sshll.u32 %s464_s21, 4  ;;  %s467_s13 = int_to_ptr.hbm [resolvable:$true] %s466_s13 }
  0x36   : > { %s2710_s30 = scalar_select %p2465_p8, 1, 0 }
  0x37   : > { %s468_s2 = sshll.u32 %s461_s19, 4  ;;  %p2475_p10 = pnand %p1787_p5, %p2446_p12  ;;  %s469_s2 = int_to_ptr.vmem [resolvable:$true] %s468_s2 }
  0x38   : > { %2711 = sst [smem:[#allocation32_spill]] %s2710_s30  ;;  %s1463_s6 = sshll.u32 %s458_s29, 4 }
  0x39   : > { %s475_s7 = sand.u32 1, %s2260_s28   ;;  %s459_s8 = scalar_lea.sflag [#allocation4], %s458_s29 }
  0x3a   : > { %s2082_s10 = sshra.s32 %s467_s13, 4  ;;  %p2086_p11 = pneg %p2475_p10  ;;  %s2083_s10 = int_to_ptr.hbm [resolvable:$true] %s2082_s10 }
  0x3b   : > { %s2084_s17 = scalar_lea.hbm %s2083_s10, 1  ;;  %s2089_s23 = scalar_lea.hbm %s2666_s0, 2 }
  0x3c   : > { %p2085_p9 = scmp.ne.s32.totalorder %s2083_s10, %s2084_s17  ;;  %p2090_p12 = scmp.lt.s32.totalorder %s2083_s10, %s2666_s0 }
  0x3d   : > { %p2091_p5 = scmp.lt.s32.totalorder %s2089_s23, %s2084_s17 }
  0x3e   : > { %p2087_p2 = pnand %p2086_p11, %p2085_p9 }
  0x3f   : > { %p2092_p0 = por %p2091_p5, %p2090_p12 }
  0x40   : > { %p2088_p6 = pneg %p2087_p2 }
  0x42   : > { %p2093_p3 = pnand %p2092_p0, %p2088_p6 }
  0x44   : > { %2096 = shalt.err (!%p2093_p3)
}
  0x45   : > { %1773 = dma.hbm_to_vmem [thread:$0]  (!%p2475_p10), %s467_s13, 16, %s469_s2, %s459_s8  }
  0x46   : > { %s479_s29 = scalar_lea.vmem [#allocation6], %s1463_s6  ;;  %s1654_s18 = sshll.u32 %s2260_s28, 4 }
  0x47   : > { %s487_s27 = sshll.u32 %s479_s29, 4  ;;  %s484_s4 = scalar_lea.hbm %s2667_s1, %s1654_s18  ;;  %s488_s27 = int_to_ptr.vmem [resolvable:$true] %s487_s27 }
  0x48   : > { %s485_s25 = sshll.u32 %s484_s4, 4  ;;  %s476_s10 = scalar_lea.sflag [#allocation7], %s475_s7  ;;  %s486_s25 = int_to_ptr.hbm [resolvable:$true] %s485_s25 }
  0x49   : > { %s2112_s17 = sshra.s32 %s486_s25, 4  ;;  %s2119_s8 = scalar_lea.hbm %s2667_s1, 32  ;;  %s2113_s17 = int_to_ptr.hbm [resolvable:$true] %s2112_s17 }
  0x4a   : > { %s2114_s23 = scalar_lea.hbm %s2113_s17, 16  ;;  %p2120_p9 = scmp.lt.s32.totalorder %s2113_s17, %s2667_s1 }
  0x4b   : > { %p2115_p3 = scmp.ne.s32.totalorder %s2113_s17, %s2114_s23  ;;  %p2121_p2 = scmp.lt.s32.totalorder %s2119_s8, %s2114_s23 }
  0x4d   : > { %p2117_p6 = pnand %p2115_p3, %p2086_p11  ;;  %p2122_p12 = por %p2121_p2, %p2120_p9 }
  0x4f   : > { %p2118_p0 = pneg %p2117_p6 }
  0x51   : > { %p2123_p5 = pnand %p2122_p12, %p2118_p0 }
  0x53   : > { %2126 = shalt.err (!%p2123_p5)
}
  0x54   : > { %s2713_s7 = smov 4   ;;  %s2714_s18 = smov 64  }
  0x55   : > { %1776 = dma.hbm_to_vmem [thread:$0]  (!%p2475_p10), %s486_s25, 256, %s488_s27, %s476_s10, %s2714_s18, %s2714_s18, %s2713_s7  }
  0x56   : > { %499 = sbr.rel (%p2376_p4) target bundleno = 1042 (0x412), region = 68  ;;  %s2514_s30 = sand.u32 (!%p2376_p4), 1, %s2252_s26  }
  0x57   : > { %s502_s19 = scalar_lea.sflag (!%p2376_p4), [#allocation4], %s2514_s30  ;;  %s504_s29 = scalar_lea.vmem (!%p2376_p4), [#allocation3], %s2514_s30 }
  0x5b   : > { %2215 = dma.done.wait (%p2452_p13), %s502_s19, 16  }
  0x5c   : > { %2217 = vsyncadd (%p2452_p13), %s502_s19, 4294967280  ;;  %s510_s25 = sand.u32 1, %s2370_s15   ;;  %s1467_s27 = sshll.u32 %s2514_s30, 4 }
  0x5d   : > { %s511_s16 = scalar_lea.sflag [#allocation7], %s510_s25  ;;  %s2524_s14 = scalar_lea.vmem [#allocation6], %s1467_s27 }
  0x5e   : > { %2219 = dma.done.wait (%p2452_p13), %s511_s16, 256  }
  0x5f   : > { %2221 = vsyncadd (%p2452_p13), %s511_s16, 4294967040 }
  0x60   : > { %2223 = dma.done.wait (%p58_p1), [#allocation7], 1024  }
  0x61   : > { %2225 = vsyncadd (%p58_p1), [#allocation7], 4294966272 }
  0x62   : > { %2227 = dma.done.wait (%p58_p1), [#allocation10], 1152  }
  0x63   : > { %2229 = vsyncadd (%p58_p1), [#allocation10], 4294966144 }
  0x64   : > { %2231 = dma.done.wait (%p58_p1), [#allocation13], 2048  }
  0x65   : > { %2233 = vsyncadd (%p58_p1), [#allocation13], 4294965248 }
  0x66   : > { %2235 = dma.done.wait (%p58_p1), [#allocation16], 1024  }
  0x67   : > { %2237 = vsyncadd (%p58_p1), [#allocation16], 4294966272  ;;  %s2546_s20 = scalar_lea.vmem [#allocation17], %s1467_s27  ;;  %p2715_p4 = scmp.ne.s32.totalorder %s2370_s15, 0 }
  0x69   : > { %599 = sbr.rel (%p2715_p4) target bundleno = 112 (0x70), region = 104 }
  0x6e   : > { %v2270_v0 = vmov 0.0  }
  0x6f   : > { %600 = vst [vmem:[#allocation2] sm:$0xff] %v2270_v0 }
  0x70 PF: > { %v1664_v1 = vld [vmem:[#allocation8 + $0x38] sm:$0xff]  ;;  %v1663_v2 = vld [vmem:[#allocation8 + $0x30] sm:$0xff]  ;;  %v1662_v3 = vld [vmem:[#allocation8 + $0x28] sm:$0xff]  ;;  %v2271_v62 = vmov 1065369472   ;;  %vm976_vm1 = vcmask 261120  }
  0x71   : > { %685 = vmatpush.bf16.msra.mxu0 %v1664_v1  ;;  %1709 = vmatpush.bf16.msra.mxu3 %v1664_v1  ;;  %v1661_v4 = vld [vmem:[#allocation8 + $0x20] sm:$0xff]  ;;  %v1660_v5 = vld [vmem:[#allocation8 + $0x18] sm:$0xff]  ;;  %v1659_v6 = vld [vmem:[#allocation8 + $0x10] sm:$0xff]  ;;  %v2567_v63 = vunpack.c.h.bf16 %v2271_v62  ;;  %p1550_p1 = scmp.ne.s32.totalorder %s2370_s15, 1 }
  0x72   : > { %v1658_v7 = vld [vmem:[#allocation8 + $0x8] sm:$0xff]  ;;  %v1657_v8 = vld [vmem:[#allocation8] sm:$0xff]  ;;  %v1672_v11 = vld [vmem:[#allocation9 + $0x38] sm:$0xff] }
  0x73   : > { %v1655_v9 = vld [vmem:[%s2524_s14] sm:$0xff]  ;;  %v1656_v10 = vld [vmem:[%s2524_s14 + $0x8] sm:$0xff]  ;;  %852 = vmatpush.bf16.msra.mxu1 %v1672_v11 }
  0x74   : > { %v1671_v12 = vld [vmem:[#allocation9 + $0x30] sm:$0xff]  ;;  %v1670_v14 = vld [vmem:[#allocation9 + $0x28] sm:$0xff]  ;;  %v1669_v17 = vld [vmem:[#allocation9 + $0x20] sm:$0xff] }
  0x75   : > { %686 = vmatpush.bf16.msra.mxu0 %v1663_v2  ;;  %1710 = vmatpush.bf16.msra.mxu3 %v1663_v2  ;;  %v1843_v13 = vld [vmem:[%s2669_s3] ss:$0 sm:$0xff]  ;;  %v1668_v20 = vld [vmem:[#allocation9 + $0x18] sm:$0xff]  ;;  %v1666_v31 = vld [vmem:[#allocation9 + $0x8] sm:$0xff] }
  0x76   : > { %v1667_v28 = vld [vmem:[#allocation9 + $0x10] sm:$0xff]  ;;  %v1665_v38 = vld [vmem:[#allocation9] sm:$0xff] }
  0x77   : > { %853 = vmatpush.bf16.msra.mxu1 %v1671_v12 }
  0x79   : > { %687 = vmatpush.bf16.msra.mxu0 %v1662_v3  ;;  %1711 = vmatpush.bf16.msra.mxu3 %v1662_v3 }
  0x7b   : > { %854 = vmatpush.bf16.msra.mxu1 %v1670_v14 }
  0x7d   : > { %688 = vmatpush.bf16.msra.mxu0 %v1661_v4  ;;  %1712 = vmatpush.bf16.msra.mxu3 %v1661_v4  ;;  %v2569_v4 = vunpack.c.l.bf16 %v2271_v62 }
  0x7f   : > { %855 = vmatpush.bf16.msra.mxu1 %v1669_v17 }
  0x81   : > { %689 = vmatpush.bf16.msra.mxu0 %v1660_v5  ;;  %1713 = vmatpush.bf16.msra.mxu3 %v1660_v5 }
  0x83   : > { %856 = vmatpush.bf16.msra.mxu1 %v1668_v20 }
  0x85   : > { %690 = vmatpush.bf16.msra.mxu0 %v1659_v6  ;;  %1714 = vmatpush.bf16.msra.mxu3 %v1659_v6 }
  0x87   : > { %857 = vmatpush.bf16.msra.mxu1 %v1667_v28 }
  0x89   : > { %691 = vmatpush.bf16.msra.mxu0 %v1658_v7  ;;  %1715 = vmatpush.bf16.msra.mxu3 %v1658_v7 }
  0x8b   : > { %858 = vmatpush.bf16.msra.mxu1 %v1666_v31 }
  0x8d   : > { %692 = vmatpush.bf16.msra.mxu0 %v1657_v8  ;;  %1716 = vmatpush.bf16.msra.mxu3 %v1657_v8 }
  0x8f   : > { %859 = vmatpush.bf16.msra.mxu1 %v1665_v38 }
  0x90   : > { %693 = vmatmul.bf16.vlgmr.msra.gmra.mxu0 %v1655_v9  ;;  %698 = vmatmul.bf16.vlgmr.msra.gmra.mxu3 %v1656_v10 }
 0x10d   : > { %v694_v15 = vpop.f32.mrf.mxu0 }
 0x10e   : > { %v695_v16 = vadd.f32 %v1843_v13, %v694_v15 }
 0x110   : > { %v2555_v18 = vpack.c.bf16 %v695_v16, %v695_v16 }
 0x112   : > { %v708_v19 = vxor.u32 2147516416, %v2555_v18 }
 0x113   : > { %v699_v21 = vpop.f32.mrf.mxu3 }
 0x114   : > { %v712_v22 = vunpack.c.l.bf16 %v708_v19  ;;  %v700_v23 = vadd.f32 %v1843_v13, %v699_v21 }
 0x115   : > { %v696_v24 = vpop.f32.mrf.mxu0 }
 0x116   : > { %v716_v25 = vmul.f32 1.442695, %v712_v22  ;;  %v2558_v26 = vpack.c.bf16 %v700_v23, %v700_v23  ;;  %v697_v27 = vadd.f32 %v1843_v13, %v696_v24  ;;  %v770_v24 = vunpack.c.l.bf16 %v2555_v18 }
 0x118   : > { %1846 = vpow2.f32 %v716_v25  ;;  %v710_v29 = vxor.u32 2147516416, %v2558_v26  ;;  %v2561_v30 = vpack.c.bf16 %v697_v27, %v697_v27 }
 0x11a   : > { %v714_v32 = vunpack.c.l.bf16 %v710_v29  ;;  %v709_v33 = vxor.u32 2147516416, %v2561_v30  ;;  %v771_v25 = vunpack.c.l.bf16 %v2561_v30 }
 0x11b   : > { %v701_v34 = vpop.f32.mrf.mxu3 }
 0x11c   : > { %v720_v35 = vmul.f32 1.442695, %v714_v32  ;;  %v713_v36 = vunpack.c.l.bf16 %v709_v33  ;;  %v702_v37 = vadd.f32 %v1843_v13, %v701_v34 }
 0x11e   : > { %v1847_v39 = vpop.eup %1846  ;;  %1848 = vpow2.f32 %v720_v35  ;;  %v718_v40 = vmul.f32 1.442695, %v713_v36  ;;  %v2564_v41 = vpack.c.bf16 %v702_v37, %v702_v37 }
 0x11f   : > { %v724_v42 = vpack.c.bf16 %v1847_v39, %v1847_v39 }
 0x120   : > { %1850 = vpow2.f32 %v718_v40  ;;  %v711_v43 = vxor.u32 2147516416, %v2564_v41  ;;  %v773_v30 = vunpack.c.l.bf16 %v2564_v41 }
 0x121   : > { %v728_v44 = vunpack.c.l.bf16 %v724_v42 }
 0x122   : > { %v715_v45 = vunpack.c.l.bf16 %v711_v43  ;;  %v772_v43 = vunpack.c.l.bf16 %v2558_v26 }
 0x123   : > { %v732_v46 = vadd.f32 1.0, %v728_v44 }
 0x124   : > { %v1849_v47 = vpop.eup %1848  ;;  %v722_v48 = vmul.f32 1.442695, %v715_v45 }
 0x125   : > { %v736_v49 = vpack.c.bf16 %v732_v46, %v732_v46  ;;  %v726_v50 = vpack.c.bf16 %v1849_v47, %v1849_v47  ;;  %v1844_v47 = vld [vmem:[%s2671_s5] ss:$0 sm:$0xff] }
 0x126   : > { %v1851_v51 = vpop.eup %1850  ;;  %1852 = vpow2.f32 %v722_v48 }
 0x127   : > { %v742_v52 = vunpack.c.h.bf16 %v736_v49  ;;  %v743_v53 = vunpack.c.l.bf16 %v736_v49  ;;  %v725_v54 = vpack.c.bf16 %v1851_v51, %v1851_v51  ;;  %v730_v55 = vunpack.c.l.bf16 %v726_v50 }
 0x129   : > { %1854 = vrcp.f32 %v742_v52  ;;  %v729_v56 = vunpack.c.l.bf16 %v725_v54  ;;  %v734_v59 = vadd.f32 1.0, %v730_v55 }
 0x12a   : > { %1856 = vrcp.f32 %v743_v53 }
 0x12b   : > { %v733_v57 = vadd.f32 1.0, %v729_v56  ;;  %v738_v6 = vpack.c.bf16 %v734_v59, %v734_v59 }
 0x12c   : > { %v1853_v58 = vpop.eup %1852 }
 0x12d   : > { %v737_v60 = vpack.c.bf16 %v733_v57, %v733_v57  ;;  %v727_v61 = vpack.c.bf16 %v1853_v58, %v1853_v58  ;;  %v756_v11 = vunpack.c.h.bf16 %v738_v6  ;;  %v757_v14 = vunpack.c.l.bf16 %v738_v6 }
 0x12f   : > { %v1855_v0 = vpop.eup %1854  ;;  %v749_v1 = vunpack.c.h.bf16 %v737_v60  ;;  %v750_v2 = vunpack.c.l.bf16 %v737_v60  ;;  %v731_v3 = vunpack.c.l.bf16 %v727_v61 }
 0x130   : > { %v1857_v5 = vpop.eup %1856  ;;  %v745_v9 = vmul.f32 %v1855_v0, %v2567_v63 }
 0x131   : > { %1858 = vrcp.f32 %v749_v1  ;;  %v735_v7 = vadd.f32 1.0, %v731_v3  ;;  %v747_v10 = vmul.f32 %v1857_v5, %v2569_v4 }
 0x132   : > { %1860 = vrcp.f32 %v750_v2 }
 0x133   : > { %v739_v8 = vpack.c.bf16 %v735_v7, %v735_v7  ;;  %v748_v16 = vpack.c.bf16 %v745_v9, %v747_v10 }
 0x135   : > { %v763_v12 = vunpack.c.h.bf16 %v739_v8  ;;  %v764_v13 = vunpack.c.l.bf16 %v739_v8  ;;  %v774_v22 = vunpack.c.l.bf16 %v748_v16 }
 0x137   : > { %v1859_v15 = vpop.eup %1858  ;;  %1862 = vrcp.f32 %v763_v12  ;;  %v778_v31 = vmul.f32 %v774_v22, %v770_v24 }
 0x138   : > { %v1861_v17 = vpop.eup %1860  ;;  %1864 = vrcp.f32 %v764_v13  ;;  %v752_v19 = vmul.f32 %v1859_v15, %v2567_v63 }
 0x139   : > { %1866 = vrcp.f32 %v756_v11  ;;  %v754_v20 = vmul.f32 %v1861_v17, %v2569_v4 }
 0x13a   : > { %1868 = vrcp.f32 %v757_v14 }
 0x13b   : > { %v755_v21 = vpack.c.bf16 %v752_v19, %v754_v20 }
 0x13d   : > { %v1863_v23 = vpop.eup %1862  ;;  %v775_v27 = vunpack.c.l.bf16 %v755_v21 }
 0x13e   : > { %v1865_v28 = vpop.eup %1864  ;;  %v766_v35 = vmul.f32 %v1863_v23, %v2567_v63 }
 0x13f   : > { %v1867_v29 = vpop.eup %1866  ;;  %v779_v32 = vmul.f32 %v775_v27, %v771_v25  ;;  %v768_v36 = vmul.f32 %v1865_v28, %v2569_v4 }
 0x140   : > { %v1869_v33 = vpop.eup %1868  ;;  %v759_v37 = vmul.f32 %v1867_v29, %v2567_v63 }
 0x141   : > { %v782_v34 = vpack.c.bf16 %v779_v32, %v778_v31  ;;  %v761_v38 = vmul.f32 %v1869_v33, %v2569_v4  ;;  %v769_v39 = vpack.c.bf16 %v766_v35, %v768_v36 }
 0x143   : > { %860 = vmatmul.bf16.vlgmr.msra.gmra.mxu1 %v782_v34  ;;  %v762_v18 = vpack.c.bf16 %v759_v37, %v761_v38  ;;  %v777_v40 = vunpack.c.l.bf16 %v769_v39 }
 0x145   : > { %v776_v42 = vunpack.c.l.bf16 %v762_v18  ;;  %v781_v44 = vmul.f32 %v777_v40, %v773_v30 }
 0x147   : > { %v780_v45 = vmul.f32 %v776_v42, %v772_v43 }
 0x149   : > { %v783_v46 = vpack.c.bf16 %v781_v44, %v780_v45 }
 0x153   : > { %865 = vmatmul.bf16.gmra.mxu1 %v783_v46 }
 0x1c0   : > { %v861_v48 = vpop.f32.mrf.mxu1 }
 0x1c1   : > { %v862_v49 = vadd.f32 %v1844_v47, %v861_v48 }
 0x1c3   : > { %v2586_v50 = vpack.c.bf16 %v862_v49, %v862_v49 }
 0x1c5   : > { %v875_v51 = vxor.u32 2147516416, %v2586_v50  ;;  %v935_v46 = vunpack.c.l.bf16 %v2586_v50 }
 0x1c7   : > { %v879_v52 = vunpack.c.l.bf16 %v875_v51 }
 0x1c8   : > { %v863_v53 = vpop.f32.mrf.mxu1 }
 0x1c9   : > { %v883_v41 = vmul.f32 1.442695, %v879_v52  ;;  %v864_v54 = vadd.f32 %v1844_v47, %v863_v53 }
 0x1cb   : > { %1870 = vpow2.f32 %v883_v41  ;;  %v2589_v26 = vpack.c.bf16 %v864_v54, %v864_v54 }
 0x1cd   : > { %v876_v55 = vxor.u32 2147516416, %v2589_v26 }
 0x1cf   : > { %v880_v56 = vunpack.c.l.bf16 %v876_v55 }
 0x1d0   : > { %v866_v57 = vpop.f32.mrf.mxu1 }
 0x1d1   : > { %v1871_v58 = vpop.eup %1870  ;;  %v885_v59 = vmul.f32 1.442695, %v880_v56  ;;  %v867_v60 = vadd.f32 %v1844_v47, %v866_v57 }
 0x1d2   : > { %v891_v61 = vpack.c.bf16 %v1871_v58, %v1871_v58 }
 0x1d3   : > { %1872 = vpow2.f32 %v885_v59  ;;  %v2592_v62 = vpack.c.bf16 %v867_v60, %v867_v60 }
 0x1d4   : > { %v895_v0 = vunpack.c.l.bf16 %v891_v61 }
 0x1d5   : > { %v877_v1 = vxor.u32 2147516416, %v2592_v62 }
 0x1d6   : > { %v899_v2 = vadd.f32 1.0, %v895_v0  ;;  %v937_v0 = vunpack.c.l.bf16 %v2592_v62 }
 0x1d7   : > { %v881_v3 = vunpack.c.l.bf16 %v877_v1 }
 0x1d8   : > { %v903_v5 = vpack.c.bf16 %v899_v2, %v899_v2  ;;  %v868_v6 = vpop.f32.mrf.mxu1 }
 0x1d9   : > { %v1873_v7 = vpop.eup %1872  ;;  %v887_v8 = vmul.f32 1.442695, %v881_v3  ;;  %v869_v9 = vadd.f32 %v1844_v47, %v868_v6  ;;  %v936_v47 = vunpack.c.l.bf16 %v2589_v26 }
 0x1da   : > { %v907_v10 = vunpack.c.h.bf16 %v903_v5  ;;  %v908_v11 = vunpack.c.l.bf16 %v903_v5  ;;  %v892_v12 = vpack.c.bf16 %v1873_v7, %v1873_v7  ;;  %v956_v5 = vlaneseq }
 0x1db   : > { %1874 = vpow2.f32 %v887_v8  ;;  %v2595_v13 = vpack.c.bf16 %v869_v9, %v869_v9 }
 0x1dc   : > { %1876 = vrcp.f32 %v907_v10  ;;  %v896_v14 = vunpack.c.l.bf16 %v892_v12  ;;  %v957_v10 = vshrl.u32 %v956_v5, 7 }
 0x1dd   : > { %1878 = vrcp.f32 %v908_v11  ;;  %v878_v15 = vxor.u32 2147516416, %v2595_v13  ;;  %v938_v6 = vunpack.c.l.bf16 %v2595_v13  ;;  %v1845_v11 = vld [vmem:[%s504_s29] ss:$0 sm:$0xff] }
 0x1de   : > { %v900_v16 = vadd.f32 1.0, %v896_v14  ;;  %vm959_vm0 = vcmp.eq.s32.totalorder %v957_v10, %v1845_v11 }
 0x1df   : > { %v882_v17 = vunpack.c.l.bf16 %v878_v15 }
 0x1e0   : > { %v904_v19 = vpack.c.bf16 %v900_v16, %v900_v16 }
 0x1e1   : > { %v1875_v20 = vpop.eup %1874  ;;  %v889_v21 = vmul.f32 1.442695, %v882_v17 }
 0x1e2   : > { %v1877_v22 = vpop.eup %1876  ;;  %v914_v23 = vunpack.c.h.bf16 %v904_v19  ;;  %v915_v24 = vunpack.c.l.bf16 %v904_v19  ;;  %v893_v25 = vpack.c.bf16 %v1875_v20, %v1875_v20 }
 0x1e3   : > { %v1879_v27 = vpop.eup %1878  ;;  %1880 = vpow2.f32 %v889_v21  ;;  %v910_v29 = vmul.f32 %v1877_v22, %v2567_v63  ;;  %v2272_v22 = vmov 0.0  }
 0x1e4   : > { %1882 = vrcp.f32 %v914_v23  ;;  %v897_v28 = vunpack.c.l.bf16 %v893_v25  ;;  %v912_v31 = vmul.f32 %v1879_v27, %v2569_v4  ;;  %v1548_v13 = vsel %vm959_vm0, 1.0, %v2272_v22  ;;  %v963_v25 = vld [vmem:[#allocation2] sm:$0xff] }
 0x1e5   : > { %1884 = vrcp.f32 %v915_v24  ;;  %v962_v24 = vpack.c.bf16 %v1548_v13, %v1548_v13 }
 0x1e6   : > { %v901_v32 = vadd.f32 1.0, %v897_v28  ;;  %v913_v36 = vpack.c.bf16 %v910_v29, %v912_v31 }
 0x1e8   : > { %v905_v33 = vpack.c.bf16 %v901_v32, %v901_v32  ;;  %v939_v43 = vunpack.c.l.bf16 %v913_v36 }
 0x1e9   : > { %v1881_v34 = vpop.eup %1880 }
 0x1ea   : > { %v1883_v35 = vpop.eup %1882  ;;  %v921_v37 = vunpack.c.h.bf16 %v905_v33  ;;  %v922_v38 = vunpack.c.l.bf16 %v905_v33  ;;  %v894_v39 = vpack.c.bf16 %v1881_v34, %v1881_v34  ;;  %v943_v52 = vmul.f32 %v939_v43, %v935_v46 }
 0x1eb   : > { %v1885_v18 = vpop.eup %1884  ;;  %v917_v40 = vmul.f32 %v1883_v35, %v2567_v63 }
 0x1ec   : > { %v919_v30 = vmul.f32 %v1885_v18, %v2569_v4  ;;  %1886 = vrcp.f32 %v921_v37  ;;  %v898_v42 = vunpack.c.l.bf16 %v894_v39  ;;  %v947_v62 = vpack.c.bf16 %v943_v52, %v943_v52 }
 0x1ed   : > { %1888 = vrcp.f32 %v922_v38 }
 0x1ee   : > { %v920_v44 = vpack.c.bf16 %v917_v40, %v919_v30  ;;  %v902_v45 = vadd.f32 1.0, %v898_v42  ;;  %v968_v21 = vunpack.c.l.b16 %v947_v62 }
 0x1f0   : > { %v940_v48 = vunpack.c.l.bf16 %v920_v44  ;;  %v906_v49 = vpack.c.bf16 %v902_v45, %v902_v45 }
 0x1f2   : > { %v1887_v51 = vpop.eup %1886  ;;  %v944_v53 = vmul.f32 %v940_v48, %v936_v47  ;;  %v928_v41 = vunpack.c.h.bf16 %v906_v49  ;;  %v929_v54 = vunpack.c.l.bf16 %v906_v49 }
 0x1f3   : > { %v1889_v55 = vpop.eup %1888  ;;  %v924_v56 = vmul.f32 %v1887_v51, %v2567_v63 }
 0x1f4   : > { %v1701_v57 = vpack.c.bf16 %v944_v53, %v943_v52  ;;  %1890 = vrcp.f32 %v928_v41  ;;  %v926_v58 = vmul.f32 %v1889_v55, %v2569_v4  ;;  %v948_v15 = vpack.c.bf16 %v944_v53, %v944_v53 }
 0x1f5   : > { %1892 = vrcp.f32 %v929_v54 }
 0x1f6   : > { %1702 = vst [vmem:[%s2546_s20] sm:$0xff] %v1701_v57   ;;  %v927_v50 = vpack.c.bf16 %v924_v56, %v926_v58  ;;  %v969_v20 = vunpack.c.l.b16 %v948_v15 }
 0x1f8   : > { %v941_v26 = vunpack.c.l.bf16 %v927_v50  ;;  %v972_v23 = vpack.c.b16 %v969_v20, %v968_v21 }
 0x1fa   : > { %v1891_v59 = vpop.eup %1890  ;;  %v945_v3 = vmul.f32 %v941_v26, %v937_v0 }
 0x1fb   : > { %v1893_v60 = vpop.eup %1892  ;;  %v931_v61 = vmul.f32 %v1891_v59, %v2567_v63 }
 0x1fc   : > { %v933_v1 = vmul.f32 %v1893_v60, %v2569_v4  ;;  %v949_v9 = vpack.c.bf16 %v945_v3, %v945_v3 }
 0x1fe   : > { %v934_v2 = vpack.c.bf16 %v931_v61, %v933_v1  ;;  %v970_v16 = vunpack.c.l.b16 %v949_v9 }
 0x200   : > { %v942_v7 = vunpack.c.l.bf16 %v934_v2 }
 0x202   : > { %v946_v8 = vmul.f32 %v942_v7, %v938_v6 }
 0x204   : > { %v950_v12 = vpack.c.bf16 %v946_v8, %v946_v8  ;;  %v1706_v14 = vpack.c.bf16 %v946_v8, %v945_v3 }
 0x206   : > { %1708 = vst [vmem:[%s2546_s20 + $0x8] sm:$0xff] %v1706_v14   ;;  %v971_v17 = vunpack.c.l.b16 %v950_v12 }
 0x208   : > { %v973_v19 = vpack.c.b16 %v971_v17, %v970_v16 }
 0x20a   : > { %986 = vmatpush.bf16.msra.mxu2 %v973_v19 }
 0x20e   : > { %987 = vmatpush.bf16.msra.mxu2 %v972_v23 }
 0x211   : > { %1549 = vmatmul.msk.bf16.vlgmr.msra.gmra.mxu2 %vm976_vm1, %v962_v24 }
 0x294   : > { %v989_v27 = vpop.f32.mrf.mxu2 }
 0x295   : > { %v993_v28 = vadd.f32 %v989_v27, %v963_v25 }
 0x297   : > { %994 = vst [vmem:[#allocation2] sm:$0xff] %v993_v28 }
 0x298   : > { %998 = sbr.rel (%p1550_p1) target bundleno = 1015 (0x3f7), region = 108 }
 0x29c   : > { %v991_v29 = vpop.f32.mrf.mxu2 }
 0x29d   : > { %v1688_v31 = vld [vmem:[#allocation14 + $0x38] sm:$0xff]  ;;  %v1687_v33 = vld [vmem:[#allocation14 + $0x30] sm:$0xff]  ;;  %v1686_v35 = vld [vmem:[#allocation14 + $0x28] sm:$0xff] }
 0x29e   : > { %v1680_v32 = vld [vmem:[#allocation12 + $0x38] sm:$0xff]  ;;  %1083 = vmatpush.bf16.msra.mxu0 %v1688_v31  ;;  %v1679_v34 = vld [vmem:[#allocation12 + $0x30] sm:$0xff]  ;;  %v1678_v36 = vld [vmem:[#allocation12 + $0x28] sm:$0xff] }
 0x29f   : > { %1144 = vmatpush.bf16.msra.mxu1 %v1680_v32  ;;  %v1685_v37 = vld [vmem:[#allocation14 + $0x20] sm:$0xff]  ;;  %v1684_v39 = vld [vmem:[#allocation14 + $0x18] sm:$0xff]  ;;  %v1683_v40 = vld [vmem:[#allocation14 + $0x10] sm:$0xff] }
 0x2a0   : > { %v1677_v38 = vld [vmem:[#allocation12 + $0x20] sm:$0xff]  ;;  %v1676_v18 = vld [vmem:[#allocation12 + $0x18] sm:$0xff]  ;;  %v1675_v30 = vld [vmem:[#allocation12 + $0x10] sm:$0xff] }
 0x2a1   : > { %v1682_v42 = vld [vmem:[#allocation14 + $0x8] sm:$0xff]  ;;  %v1681_v44 = vld [vmem:[#allocation14] sm:$0xff]  ;;  %v999_v47 = vld [vmem:[#allocation11] sm:$0xff] }
 0x2a2   : > { %1084 = vmatpush.bf16.msra.mxu0 %v1687_v33  ;;  %v1674_v43 = vld [vmem:[#allocation12 + $0x8] sm:$0xff]  ;;  %v1673_v45 = vld [vmem:[#allocation12] sm:$0xff]  ;;  %v1000_v49 = vpack.c.bf16 %v999_v47, %v999_v47  ;;  %v1696_v51 = vld [vmem:[#allocation15 + $0x38] sm:$0xff] }
 0x2a3   : > { %1145 = vmatpush.bf16.msra.mxu1 %v1679_v34  ;;  %v1017_v46 = vld [vmem:[#allocation2] sm:$0xff]  ;;  %1250 = vmatpush.bf16.msra.mxu2 %v1696_v51  ;;  %v1693_v41 = vld [vmem:[#allocation15 + $0x20] sm:$0xff]  ;;  %v1692_v54 = vld [vmem:[#allocation15 + $0x18] sm:$0xff] }
 0x2a4   : > { %v1018_v48 = vpack.c.bf16 %v1017_v46, %v1017_v46  ;;  %v1695_v52 = vld [vmem:[#allocation15 + $0x30] sm:$0xff]  ;;  %v1694_v53 = vld [vmem:[#allocation15 + $0x28] sm:$0xff]  ;;  %v1689_v2 = vld [vmem:[#allocation15] sm:$0xff] }
 0x2a5   : > { %v1894_v55 = vld [vmem:[%s2675_s9] ss:$0 sm:$0xff]  ;;  %v1691_v58 = vld [vmem:[#allocation15 + $0x10] sm:$0xff] }
 0x2a6   : > { %1085 = vmatpush.bf16.msra.mxu0 %v1686_v35  ;;  %v1690_v26 = vld [vmem:[#allocation15 + $0x8] sm:$0xff] }
 0x2a7   : > { %1146 = vmatpush.bf16.msra.mxu1 %v1678_v36  ;;  %1251 = vmatpush.bf16.msra.mxu2 %v1695_v52  ;;  %v1895_v13 = vld [vmem:[%s2677_s11] ss:$0 sm:$0xff] }
 0x2aa   : > { %1086 = vmatpush.bf16.msra.mxu0 %v1685_v37 }
 0x2ab   : > { %1147 = vmatpush.bf16.msra.mxu1 %v1677_v38  ;;  %1252 = vmatpush.bf16.msra.mxu2 %v1694_v53 }
 0x2ae   : > { %1087 = vmatpush.bf16.msra.mxu0 %v1684_v39 }
 0x2af   : > { %1148 = vmatpush.bf16.msra.mxu1 %v1676_v18  ;;  %1253 = vmatpush.bf16.msra.mxu2 %v1693_v41 }
 0x2b2   : > { %1088 = vmatpush.bf16.msra.mxu0 %v1683_v40 }
 0x2b3   : > { %1149 = vmatpush.bf16.msra.mxu1 %v1675_v30  ;;  %1254 = vmatpush.bf16.msra.mxu2 %v1692_v54 }
 0x2b6   : > { %1089 = vmatpush.bf16.msra.mxu0 %v1682_v42 }
 0x2b7   : > { %1150 = vmatpush.bf16.msra.mxu1 %v1674_v43  ;;  %1255 = vmatpush.bf16.msra.mxu2 %v1691_v58 }
 0x2ba   : > { %1090 = vmatpush.bf16.msra.mxu0 %v1681_v44 }
 0x2bb   : > { %1151 = vmatpush.bf16.msra.mxu1 %v1673_v45  ;;  %1256 = vmatpush.bf16.msra.mxu2 %v1690_v26 }
 0x2bd   : > { %1091 = vmatmul.bf16.vlgmr.msra.gmra.mxu0 %v1018_v48 }
 0x2be   : > { %1152 = vmatmul.bf16.vlgmr.msra.gmra.mxu1 %v1000_v49 }
 0x2bf   : > { %1257 = vmatpush.bf16.msra.mxu2 %v1689_v2 }
 0x33a   : > { %v1092_v56 = vpop.f32.mrf.mxu0 }
 0x33b   : > { %v1153_v57 = vpop.f32.mrf.mxu1 }
 0x33c   : > { %v1154_v50 = vadd.f32 %v1153_v57, %v1092_v56 }
 0x33e   : > { %v1161_v59 = vadd.f32 %v1894_v55, %v1154_v50 }
 0x340   : > { %v1162_v60 = vpack.c.bf16 %v1161_v59, %v1161_v59 }
 0x342   : > { %v1163_v61 = vxor.u32 2147516416, %v1162_v60  ;;  %v1094_v0 = vpop.f32.mrf.mxu0  ;;  %v1178_v19 = vunpack.c.l.bf16 %v1162_v60 }
 0x343   : > { %v1155_v1 = vpop.f32.mrf.mxu1 }
 0x344   : > { %v1164_v3 = vunpack.c.l.bf16 %v1163_v61 }
 0x346   : > { %v1165_v5 = vmul.f32 1.442695, %v1164_v3 }
 0x348   : > { %1896 = vpow2.f32 %v1165_v5 }
 0x34e   : > { %v1897_v6 = vpop.eup %1896 }
 0x34f   : > { %v1167_v7 = vpack.c.bf16 %v1897_v6, %v1897_v6 }
 0x351   : > { %v1168_v8 = vunpack.c.l.bf16 %v1167_v7 }
 0x353   : > { %v1169_v9 = vadd.f32 1.0, %v1168_v8 }
 0x355   : > { %v1170_v10 = vpack.c.bf16 %v1169_v9, %v1169_v9 }
 0x357   : > { %v1171_v11 = vunpack.c.h.bf16 %v1170_v10  ;;  %v1172_v12 = vunpack.c.l.bf16 %v1170_v10 }
 0x359   : > { %1898 = vrcp.f32 %v1171_v11 }
 0x35a   : > { %1900 = vrcp.f32 %v1172_v12 }
 0x35f   : > { %v1899_v14 = vpop.eup %1898 }
 0x360   : > { %v1901_v15 = vpop.eup %1900  ;;  %v1174_v16 = vmul.f32 %v1899_v14, %v2567_v63 }
 0x361   : > { %v1176_v17 = vmul.f32 %v1901_v15, %v2569_v4 }
 0x363   : > { %v1177_v62 = vpack.c.bf16 %v1174_v16, %v1176_v17 }
 0x365   : > { %v1179_v20 = vunpack.c.l.bf16 %v1177_v62 }
 0x367   : > { %v1180_v21 = vmul.f32 %v1179_v20, %v1178_v19 }
 0x369   : > { %v1181_v22 = vpack.c.bf16 %v1180_v21, %v1180_v21 }
 0x36b   : > { %1258 = vmatmul.bf16.vlgmr.msra.gmra.mxu2 %v1181_v22 }
 0x3ee   : > { %v1259_v23 = vpop.f32.mrf.mxu2 }
 0x3ef   : > { %v1260_v24 = vadd.f32 %v1895_v13, %v1259_v23 }
 0x3f1   : > { %v1263_v25 = vadd.f32 %v1260_v24, %v999_v47 }
 0x3f3   : > { %1264 = vst [vmem:[#allocation18] sm:$0xff] %v1263_v25 }
 0x3f6   : > { %v1261_v27 = vpop.f32.mrf.mxu2 }
 0x3f7 PF: > { %s1697_s13 = sshll.u32 %s2370_s15, 4  ;;  %s1278_s19 = sshll.u32 %s2546_s20, 4  ;;  %s1279_s19 = int_to_ptr.vmem [resolvable:$true] %s1278_s19 }
 0x3f8   : > { %s1277_s18 = scalar_lea.hbm %s2678_s12, %s1697_s13  ;;  %s1266_s25 = scalar_lea.sflag [#allocation5], %s2514_s30 }
 0x3f9   : > { %s1280_s29 = sshll.u32 %s1277_s18, 4  ;;  %s2162_s4 = scalar_lea.hbm %s2678_s12, 32  ;;  %s1281_s29 = int_to_ptr.hbm [resolvable:$true] %s1280_s29 }
 0x3fa   : > { %s2156_s27 = sshra.s32 %s1281_s29, 4  ;;  %s2157_s27 = int_to_ptr.hbm [resolvable:$true] %s2156_s27 }
 0x3fb   : > { %s2158_s16 = scalar_lea.hbm %s2157_s27, 16  ;;  %p2163_p3 = scmp.lt.s32.totalorder %s2157_s27, %s2678_s12 }
 0x3fc   : > { %p2159_p13 = scmp.ne.s32.totalorder %s2157_s27, %s2158_s16  ;;  %p2164_p6 = scmp.lt.s32.totalorder %s2162_s4, %s2158_s16 }
 0x3fe   : > { %p2160_p10 = pnand %p2159_p13, %p2461_p7  ;;  %p2165_p0 = por %p2164_p6, %p2163_p3 }
 0x400   : > { %p2161_p11 = pneg %p2160_p10 }
 0x402   : > { %p2166_p9 = pnand %p2165_p0, %p2161_p11 }
 0x404   : > { %2169 = shalt.err (!%p2166_p9)
}
 0x405   : > { %s2273_s30 = smov 64   ;;  %s2274_s20 = smov 4  }
 0x406   : > { %1745 = dma.vmem_to_hbm [thread:$0]  (%p2461_p7), %s1279_s19, 256, %s1281_s29, %s1266_s25, %s2273_s30, %s2273_s30, %s2274_s20  }
 0x407   : > { %s2275_s23 = smov [#allocation18]   ;;  %s2716_s13 = sld [smem:[#allocation39_spill]] }
 0x408   : > { %s1293_s2 = sshll.u32 %s2275_s23, 4  ;;  %p2717_p2 = scmp.eq.s32.totalorder %s2370_s15, 1  ;;  %s1294_s2 = int_to_ptr.vmem [resolvable:$true] %s1293_s2 }
 0x40a   : > { %p2718_p12 = pmov %p2717_p2 }
 0x40d   : > { %s1295_s21 = sshll.u32 %s2716_s13, 4  ;;  %s1296_s21 = int_to_ptr.hbm [resolvable:$true] %s1295_s21 }
 0x40e   : > { %1747 = dma.vmem_to_hbm [thread:$0]  (%p2717_p2), %s1294_s2, 128, %s1296_s21, [#allocation19]  }
 0x40f   : > { %2239 = dma.done.wait (%p2718_p12), [#allocation19], 128   ;;  %p2719_p5 = pmov %p2717_p2 }
 0x411   : > { %2241 = vsyncadd (%p2719_p5), [#allocation19], 4294967168 }
 0x412 PF: > { %s2720_s7 = sld [smem:[#allocation28_spill]]  ;;  %p2722_p7 = scmp.ge.s32.totalorder %s2260_s28, 2 }
 0x414   : > { %p1778_p4 = pnand %p2722_p7, %p2465_p8 }
 0x416   : > { %p1779_p1 = pneg %p1778_p4 }
 0x418   : > { %s1312_s24 = sand.u32 1, %s2720_s7  }
 0x419   : > { %s1313_s19 = scalar_lea.sflag [#allocation5], %s1312_s24 }
 0x41a   : > { %2243 = dma.done.wait (%p1779_p1), %s1313_s19, 256  }
 0x41b   : > { %2245 = vsyncadd (%p1779_p1), %s1313_s19, 4294967040  ;;  %s2723_s28 = sld [smem:[#allocation30_spill]]  ;;  %s2726_s25 = smov %s2252_s26 }
 0x41c   : > { %s2724_s29 = sld [smem:[#allocation29_spill]] }
 0x41d   : > { %s2725_s27 = sld [smem:[#allocation31_spill]] }
 0x421   : > { %p34_p13 = scmp.ge.s32.totalorder %s2723_s28, 4  }
 0x422   : > { %s2727_s26 = smov %s2724_s29 }
 0x423   :  { %36 = sbr.rel (!%p34_p13) target bundleno = 19 (0x13), region = 166 }
 0x428   :  { %1319 = vsyncpa [#allocation4], 1 }
 0x429   :  { %1321 = vsyncpa [#allocation4 + $0x1], 1 }
 0x42a   :  { %1322 = vsyncpa [#allocation7], 1 }
 0x42b   :  { %1324 = vsyncpa [#allocation7 + $0x1], 1 }
 0x42c   :  { %1325 = vsyncpa [#allocation10], 1 }
 0x42d   :  { %1326 = vsyncpa [#allocation13], 1 }
 0x42e   :  { %1327 = vsyncpa [#allocation16], 1 }
 0x42f   :  { %1328 = vsyncpa [#allocation5], 1 }
 0x430   :  { %1330 = vsyncpa [#allocation5 + $0x1], 1 }
 0x431   :  { %1331 = vsyncpa [#allocation19], 1 }

</bundles_post_ra>
